<compile_context>
chip_gen: v7x
topology: tpu7x:2x2x1
jax: 0.10.0
libtpu: 0.0.40
codegen_flags: <defaults>
</compile_context>

<pallas_src>
import jax
import jax.numpy as jnp
from jax.experimental import pallas as pl
from jax.experimental.pallas import tpu as pltpu


# ----------------------------- kernel -------------------------------------- #

def _mlp_kernel(x_ref, w1_ref, b1_ref, w2_ref, b2_ref, o_ref):
    # fused: h = relu(x @ W1 + b1); o = h @ W2 + b2
    # x / W1 / W2 arrive as bf16 (MXU operands); accumulate in f32.
    x = x_ref[...]                                                    # (TM, D_IN) bf16
    h = jnp.dot(x, w1_ref[...], preferred_element_type=jnp.float32)   # f32 acc
    h = jnp.maximum(h + b1_ref[...], 0.0)                             # bias + ReLU on VPU (f32)
    h = h.astype(jnp.bfloat16)                                        # back to bf16 for MXU
    o = jnp.dot(h, w2_ref[...], preferred_element_type=jnp.float32)
    o = o + b2_ref[...]
    o_ref[...] = o.astype(o_ref.dtype)


# ----------------------------- wrapper -------------------------------------- #

def mlp_forward(x, w1, b1, w2, b2, *, tm=None, out_dtype=jnp.bfloat16):
    """Fused 2-layer MLP.  x: (B, D_IN) bf16; weights bf16; biases (1, D) f32."""
    B, D_in = x.shape
    D_hid = w1.shape[1]
    D_out = w2.shape[1]

    if tm is None:
        # One fat tile for small/medium batches (single grid step on the serial
        # TC loop); 512-row tiles (multiple of 8 sublanes) beyond that.
        tm = B if B <= 1024 else 512
    tm = min(tm, B)
    n_tiles = pl.cdiv(B, tm)   # ragged last block: OOB output rows are masked on store

    out_itemsize = jnp.dtype(out_dtype).itemsize

    # FLOPs / bytes hint for XLA scheduling when embedded in a larger graph.
    bytes_accessed = (
        x.size * x.dtype.itemsize
        + w1.size * w1.dtype.itemsize + w2.size * w2.dtype.itemsize
        + b1.size * b1.dtype.itemsize + b2.size * b2.dtype.itemsize
        + B * D_out * out_itemsize
    )
    cost = pl.CostEstimate(
        flops=2 * B * D_in * D_hid + 2 * B * D_hid * D_out,
        transcendentals=0,
        bytes_accessed=bytes_accessed,
    )

    # VMEM budget from actual tile sizes (x/out double-buffered, weights resident),
    # with generous headroom; clamped to stay within every generation's scoped limit.
    tile_bytes = (
        2 * tm * D_in * x.dtype.itemsize
        + 2 * tm * D_out * out_itemsize
        + w1.size * w1.dtype.itemsize + w2.size * w2.dtype.itemsize
        + b1.size * b1.dtype.itemsize + b2.size * b2.dtype.itemsize
    )
    vmem_limit = int(min(max(4 * tile_bytes, 16 * 1024 * 1024), 64 * 1024 * 1024))

    out = pl.pallas_call(
        _mlp_kernel,
        out_shape=jax.ShapeDtypeStruct((B, D_out), out_dtype),
        grid_spec=pltpu.PrefetchScalarGridSpec(
            num_scalar_prefetch=0,
            grid=(n_tiles,),
            in_specs=[
                # only x is tiled over batch
                pl.BlockSpec((tm, D_in), lambda i: (i, 0)),
                # weights/biases: constant block index -> VMEM-resident across steps
                pl.BlockSpec((D_in, D_hid), lambda i: (0, 0)),
                pl.BlockSpec((1, D_hid), lambda i: (0, 0)),
                pl.BlockSpec((D_hid, D_out), lambda i: (0, 0)),
                pl.BlockSpec((1, D_out), lambda i: (0, 0)),
            ],
            out_specs=pl.BlockSpec((tm, D_out), lambda i: (i, 0)),
        ),
        compiler_params=pltpu.CompilerParams(
            dimension_semantics=("parallel",),   # shard batch tiles across TCs (v7x)
            vmem_limit_bytes=vmem_limit,
        ),
        cost_estimate=cost,
    )(x, w1, b1, w2, b2)

    return out


def unstructured_data_reasoning_forward(x, params):
    """Equivalent of UnstructuredDataReasoning.forward: inner model, then Identity."""
    w1, b1, w2, b2 = params
    y = mlp_forward(x, w1, b1, w2, b2)     # self.model(x)
    reasoning_output = y                   # nn.Identity(): pure passthrough, no kernel
    return reasoning_output


# ----------------------------- main ----------------------------------------- #

if __name__ == "__main__":
    B, D_IN, D_HID, D_OUT = 256, 128, 128, 128

    key = jax.random.PRNGKey(0)
    k_x, k_w1, k_b1, k_w2, k_b2 = jax.random.split(key, 5)

    # bf16 MXU operands; f32 biases.
    x = jax.random.normal(k_x, (B, D_IN), dtype=jnp.float32).astype(jnp.bfloat16)
    w1 = (jax.random.normal(k_w1, (D_IN, D_HID), dtype=jnp.float32) * 0.05).astype(jnp.bfloat16)
    b1 = jax.random.normal(k_b1, (1, D_HID), dtype=jnp.float32) * 0.01
    w2 = (jax.random.normal(k_w2, (D_HID, D_OUT), dtype=jnp.float32) * 0.05).astype(jnp.bfloat16)
    b2 = jax.random.normal(k_b2, (1, D_OUT), dtype=jnp.float32) * 0.01

    params = (w1, b1, w2, b2)

    out = unstructured_data_reasoning_forward(x, params)
    out = jax.block_until_ready(out)

    # Pure-JAX reference with the same bf16-operand / f32-accumulate recipe.
    # NOTE: the bf16 hidden downcast and bf16 output are numerical deviations
    # from a pure-fp32 PyTorch module; tolerances below account for that.
    ref_h = jnp.maximum(
        jnp.dot(x, w1, preferred_element_type=jnp.float32) + b1, 0.0
    ).astype(jnp.bfloat16)
    ref = (jnp.dot(ref_h, w2, preferred_element_type=jnp.float32) + b2).astype(jnp.bfloat16)

    assert out.shape == (B, D_OUT)
    assert out.dtype == jnp.bfloat16
    assert jnp.allclose(out.astype(jnp.float32), ref.astype(jnp.float32),
                        atol=2e-2, rtol=2e-2), "mismatch vs reference"

    print("KERNEL_OK")
</pallas_src>

<mosaic_0001>
module attributes {stable_mosaic.version = 11 : i64} {
  func.func @_mlp_kernel(%arg0: i32, %arg1: memref<256x128xbf16, #tpu.memory_space<vmem>>, %arg2: memref<128x128xbf16, #tpu.memory_space<vmem>>, %arg3: memref<1x128xf32, #tpu.memory_space<vmem>>, %arg4: memref<128x128xbf16, #tpu.memory_space<vmem>>, %arg5: memref<1x128xf32, #tpu.memory_space<vmem>>, %arg6: memref<256x128xbf16, #tpu.memory_space<vmem>>) attributes {dimension_semantics = [#tpu.dimension_semantics<parallel>], iteration_bounds = array<i64: 1>, scalar_prefetch = 0 : i64, scratch_operands = 0 : i64, tpu.core_type = #tpu.core_type<tc>, window_params = [{transform_indices = @transform_0, window_bounds = array<i64: 256, 128>}, {pipeline_mode = #tpu.pipeline_mode<synchronous>, transform_indices = @transform_1, window_bounds = array<i64: 128, 128>}, {pipeline_mode = #tpu.pipeline_mode<synchronous>, transform_indices = @transform_2, window_bounds = array<i64: 1, 128>}, {pipeline_mode = #tpu.pipeline_mode<synchronous>, transform_indices = @transform_3, window_bounds = array<i64: 128, 128>}, {pipeline_mode = #tpu.pipeline_mode<synchronous>, transform_indices = @transform_4, window_bounds = array<i64: 1, 128>}, {transform_indices = @transform_5, window_bounds = array<i64: 256, 128>}]} {
    %c0 = arith.constant 0 : index
    %c0_0 = arith.constant 0 : index
    %0 = vector.load %arg1[%c0, %c0_0] : memref<256x128xbf16, #tpu.memory_space<vmem>>, vector<256x128xbf16>
    %c0_1 = arith.constant 0 : index
    %c0_2 = arith.constant 0 : index
    %1 = vector.load %arg2[%c0_1, %c0_2] : memref<128x128xbf16, #tpu.memory_space<vmem>>, vector<128x128xbf16>
    %cst = arith.constant dense<0.000000e+00> : vector<256x128xf32>
    %2 = tpu.matmul %0, %1, %cst {dimension_numbers = #tpu.dot_dimension_numbers<[1], [0], [0], [1], [0, 0, 1, 1], [], []>} : vector<256x128xbf16>, vector<128x128xbf16>, vector<256x128xf32> -> vector<256x128xf32>
    %c0_3 = arith.constant 0 : index
    %c0_4 = arith.constant 0 : index
    %3 = vector.load %arg3[%c0_3, %c0_4] : memref<1x128xf32, #tpu.memory_space<vmem>>, vector<1x128xf32>
    %4 = vector.broadcast %3 : vector<1x128xf32> to vector<256x128xf32>
    %5 = arith.addf %2, %4 : vector<256x128xf32>
    %cst_5 = arith.constant 0.000000e+00 : f32
    %6 = vector.broadcast %cst_5 : f32 to vector<256x128xf32>
    %7 = arith.maximumf %5, %6 : vector<256x128xf32>
    %8 = arith.truncf %7 : vector<256x128xf32> to vector<256x128xbf16>
    %c0_6 = arith.constant 0 : index
    %c0_7 = arith.constant 0 : index
    %9 = vector.load %arg4[%c0_6, %c0_7] : memref<128x128xbf16, #tpu.memory_space<vmem>>, vector<128x128xbf16>
    %cst_8 = arith.constant dense<0.000000e+00> : vector<256x128xf32>
    %10 = tpu.matmul %8, %9, %cst_8 {dimension_numbers = #tpu.dot_dimension_numbers<[1], [0], [0], [1], [0, 0, 1, 1], [], []>} : vector<256x128xbf16>, vector<128x128xbf16>, vector<256x128xf32> -> vector<256x128xf32>
    %c0_9 = arith.constant 0 : index
    %c0_10 = arith.constant 0 : index
    %11 = vector.load %arg5[%c0_9, %c0_10] : memref<1x128xf32, #tpu.memory_space<vmem>>, vector<1x128xf32>
    %12 = vector.broadcast %11 : vector<1x128xf32> to vector<256x128xf32>
    %13 = arith.addf %10, %12 : vector<256x128xf32>
    %14 = arith.truncf %13 : vector<256x128xf32> to vector<256x128xbf16>
    %c0_11 = arith.constant 0 : index
    %c0_12 = arith.constant 0 : index
    %15 = vector.load %arg6[%c0_11, %c0_12] : memref<256x128xbf16, #tpu.memory_space<vmem>>, vector<256x128xbf16>
    tpu.vector_store %arg6[%c0_11, %c0_12], %14 {strides = array<i32>} : memref<256x128xbf16, #tpu.memory_space<vmem>>, vector<256x128xbf16>,
    return
  }
  func.func @transform_0(%arg0: i32) -> (i32, i32) {
    %c0_i32 = arith.constant 0 : i32
    %c0_i32_0 = arith.constant 0 : i32
    return %arg0, %c0_i32 : i32, i32
  }
  func.func @transform_1(%arg0: i32) -> (i32, i32) {
    %c0_i32 = arith.constant 0 : i32
    %c0_i32_0 = arith.constant 0 : i32
    %c0_i32_1 = arith.constant 0 : i32
    return %c0_i32, %c0_i32_0 : i32, i32
  }
  func.func @transform_2(%arg0: i32) -> (i32, i32) {
    %c0_i32 = arith.constant 0 : i32
    %c0_i32_0 = arith.constant 0 : i32
    %c0_i32_1 = arith.constant 0 : i32
    return %c0_i32, %c0_i32_0 : i32, i32
  }
  func.func @transform_3(%arg0: i32) -> (i32, i32) {
    %c0_i32 = arith.constant 0 : i32
    %c0_i32_0 = arith.constant 0 : i32
    %c0_i32_1 = arith.constant 0 : i32
    return %c0_i32, %c0_i32_0 : i32, i32
  }
  func.func @transform_4(%arg0: i32) -> (i32, i32) {
    %c0_i32 = arith.constant 0 : i32
    %c0_i32_0 = arith.constant 0 : i32
    %c0_i32_1 = arith.constant 0 : i32
    return %c0_i32, %c0_i32_0 : i32, i32
  }
  func.func @transform_5(%arg0: i32) -> (i32, i32) {
    %c0_i32 = arith.constant 0 : i32
    %c0_i32_0 = arith.constant 0 : i32
    return %arg0, %c0_i32 : i32, i32
  }
}

</mosaic_0001>

<bundles_post_ra>
// kernel: tpu_custom_call.1
= control target key start
LH: loop header
LB: loop body
LE: loop exit
PB: predicated region body
PF: predicated region fallthrough
CT: control target
= control target key end

     0   :  { %10 = vsyncpa [#allocation3], 0  ;;  %s1527_s0 = inlined_call_operand.hbm [shape: bf16[256,128], index: 0, kind: input, shape index: {}]   ;;  %s1528_s1 = inlined_call_operand.hbm [shape: bf16[128,128], index: 1, kind: input, shape index: {}]   ;;  %s1529_s2 = inlined_call_operand.vmem [shape: f32[1,128], index: 2, kind: input, shape index: {}]   ;;  %s1530_s3 = inlined_call_operand.hbm [shape: bf16[128,128], index: 3, kind: input, shape index: {}]   ;;  %s1531_s4 = inlined_call_operand.vmem [shape: f32[1,128], index: 4, kind: input, shape index: {}]   ;;  %s1532_s5 = inlined_call_operand.hbm [shape: bf16[256,128], index: 5, kind: output, shape index: {}]  }
   0x1   :  { %11 = vsyncpa [#allocation6], 0 }
   0x2   :  { %12 = vsyncpa [#allocation4], 0  ;;  %s1350_s18 = smov [#allocation5]   ;;  %s1351_s20 = smov [#allocation2]  }
   0x3   :  { %s30_s19 = sshll.u32 %s1350_s18, 4  ;;  %s18_s21 = sshll.u32 %s1351_s20, 4  ;;  %s31_s19 = int_to_ptr.vmem [resolvable:$true] %s30_s19  ;;  %s1386_s21 = int_to_ptr.vmem [resolvable:$true] %s18_s21 }
   0x4   :  { %s1256_s24 = scalar_lea.hbm %s1528_s1, 1024 }
   0x5   :  { %p1257_p0 = scmp.ne.s32.totalorder %s1528_s1, %s1256_s24  ;;  %p1260_p1 = scmp.lt.u32.totalorder %s1256_s24, %s1528_s1 }
   0x7   :  { %p1262_p2 = pnand %p1260_p1, %p1257_p0 }
   0x9   :  { %1265 = shalt.err (!%p1262_p2)
}
   0xa   :  { %s1266_s29 = scalar_lea.vmem %s31_s19, 1024  ;;  %p1271_p4 = scmp.lt.s32.totalorder %s31_s19, %s31_s19 }
   0xb   :  { %p1267_p3 = scmp.ne.s32.totalorder %s31_s19, %s1266_s29  ;;  %p1272_p5 = scmp.lt.s32.totalorder %s1266_s29, %s1266_s29 }
   0xd   :  { %p1273_p6 = por %p1272_p5, %p1271_p4 }
   0xf   :  { %p1274_p7 = pnand %p1273_p6, %p1267_p3 }
  0x11   :  { %1277 = shalt.err (!%p1274_p7)
}
  0x12   :  { %s1352_s30 = smov 64   ;;  %s1353_s6 = smov 4  }
  0x13   :  { %36 = dma.hbm_to_vmem [thread:$0]  %s1528_s1, 1024, %s31_s19, [#allocation6], %s1352_s30, %s1352_s30, %s1353_s6  }
  0x14   :  { %s1278_s11 = scalar_lea.hbm %s1527_s0, 2048 }
  0x15   :  { %p1279_p8 = scmp.ne.s32.totalorder %s1527_s0, %s1278_s11  ;;  %p1282_p9 = scmp.lt.u32.totalorder %s1278_s11, %s1527_s0 }
  0x17   :  { %p1284_p10 = pnand %p1282_p9, %p1279_p8 }
  0x19   :  { %1287 = shalt.err (!%p1284_p10)
}
  0x1a   :  { %s1288_s16 = scalar_lea.vmem %s1386_s21, 2048  ;;  %p1293_p12 = scmp.lt.s32.totalorder %s1386_s21, %s1386_s21 }
  0x1b   :  { %p1289_p11 = scmp.ne.s32.totalorder %s1386_s21, %s1288_s16  ;;  %p1294_p13 = scmp.lt.s32.totalorder %s1288_s16, %s1288_s16 }
  0x1d   :  { %p1295_p0 = por %p1294_p13, %p1293_p12 }
  0x1f   :  { %p1296_p1 = pnand %p1295_p0, %p1289_p11 }
  0x21   :  { %1299 = shalt.err (!%p1296_p1)
}
  0x22   :  { %24 = dma.hbm_to_vmem [thread:$0]  %s1527_s0, 2048, %s1386_s21, [#allocation3], %s1352_s30, %s1352_s30, %s1353_s6  }
  0x23   :  { %s1354_s18 = smov [#allocation7]   ;;  %s1300_s23 = scalar_lea.hbm %s1530_s3, 1024 }
  0x24   :  { %s44_s19 = sshll.u32 %s1354_s18, 4  ;;  %p1301_p2 = scmp.ne.s32.totalorder %s1530_s3, %s1300_s23  ;;  %s45_s19 = int_to_ptr.vmem [resolvable:$true] %s44_s19 }
  0x25   :  { %p1304_p3 = scmp.lt.u32.totalorder %s1300_s23, %s1530_s3 }
  0x27   :  { %p1306_p4 = pnand %p1304_p3, %p1301_p2 }
  0x29   :  { %1309 = shalt.err (!%p1306_p4)
}
  0x2a   :  { %s1310_s28 = scalar_lea.vmem %s45_s19, 1024  ;;  %p1315_p6 = scmp.lt.s32.totalorder %s45_s19, %s45_s19 }
  0x2b   :  { %p1311_p5 = scmp.ne.s32.totalorder %s45_s19, %s1310_s28  ;;  %p1316_p7 = scmp.lt.s32.totalorder %s1310_s28, %s1310_s28 }
  0x2d   :  { %p1317_p8 = por %p1316_p7, %p1315_p6 }
  0x2f   :  { %p1318_p9 = pnand %p1317_p8, %p1311_p5 }
  0x31   :  { %1321 = shalt.err (!%p1318_p9)
}
  0x32   :  { %50 = dma.hbm_to_vmem [thread:$0]  %s1530_s3, 1024, %s45_s19, [#allocation6], %s1352_s30, %s1352_s30, %s1353_s6  }
  0x33   :  { %1344 = dma.done.wait [#allocation3], 2048  }
  0x34   :  { %1345 = vsyncadd [#allocation3], 4294965248 }
  0x35   :  { %1346 = dma.done.wait [#allocation6], 2048  }
  0x36   :  { %1347 = vsyncadd [#allocation6], 4294965248  ;;  %v1224_v0 = vld [vmem:[#allocation5] sm:$0xff]   ;;  %v1225_v1 = vld [vmem:[#allocation5 + $0x8] sm:$0xff]  }
  0x37   :  { %1122 = vmatprep.subr.bf16.mxu0 %v1224_v0  ;;  %v1226_v2 = vld [vmem:[#allocation5 + $0x10] sm:$0xff]   ;;  %v1227_v3 = vld [vmem:[#allocation5 + $0x18] sm:$0xff]   ;;  %v1232_v4 = vld [vmem:[#allocation2] sm:$0xff]  }
  0x38   :  { %1123 = vmatpush3.bf16.msra.mxu0 %v1224_v0  ;;  %1138 = vmatprep.mubr.bf16.mxu0 %v1232_v4  ;;  %v1228_v5 = vld [vmem:[#allocation5 + $0x20] sm:$0xff]   ;;  %v1229_v6 = vld [vmem:[#allocation5 + $0x28] sm:$0xff]   ;;  %v1230_v7 = vld [vmem:[#allocation5 + $0x30] sm:$0xff]  }
  0x39   :  { %1124 = vmatprep.subr.bf16.mxu0 %v1225_v1  ;;  %v1231_v8 = vld [vmem:[#allocation5 + $0x38] sm:$0xff]   ;;  %v1248_v9 = vld [vmem:[#allocation7] sm:$0xff]   ;;  %v1249_v10 = vld [vmem:[#allocation7 + $0x8] sm:$0xff]  }
  0x3a   :  { %1170 = vmatprep.subr.bf16.mxu1 %v1248_v9  ;;  %v1250_v11 = vld [vmem:[#allocation7 + $0x10] sm:$0xff]   ;;  %v1233_v12 = vld [vmem:[#allocation2 + $0x8] sm:$0xff]   ;;  %v1251_v14 = vld [vmem:[#allocation7 + $0x18] sm:$0xff]  }
  0x3b   :  { %1171 = vmatpush3.bf16.msra.mxu1 %v1248_v9  ;;  %v1234_v13 = vld [vmem:[#allocation2 + $0x10] sm:$0xff]   ;;  %v1252_v15 = vld [vmem:[#allocation7 + $0x20] sm:$0xff]   ;;  %v1235_v16 = vld [vmem:[#allocation2 + $0x18] sm:$0xff]  }
  0x3c   :  { %1125 = vmatpush3.bf16.msra.mxu0 %v1225_v1  ;;  %1172 = vmatprep.subr.bf16.mxu1 %v1249_v10  ;;  %v1236_v17 = vld [vmem:[#allocation2 + $0x20] sm:$0xff]   ;;  %v1253_v18 = vld [vmem:[#allocation7 + $0x28] sm:$0xff]   ;;  %v1238_v20 = vld [vmem:[#allocation2 + $0x30] sm:$0xff]  }
  0x3d   :  { %1126 = vmatprep.subr.bf16.mxu0 %v1226_v2  ;;  %v1237_v19 = vld [vmem:[#allocation2 + $0x28] sm:$0xff]   ;;  %v1239_v21 = vld [vmem:[#allocation2 + $0x38] sm:$0xff]   ;;  %v1240_v22 = vld [vmem:[#allocation2 + $0x40] sm:$0xff]  }
  0x3e   :  { %v1241_v23 = vld [vmem:[#allocation2 + $0x48] sm:$0xff]   ;;  %v1242_v24 = vld [vmem:[#allocation2 + $0x50] sm:$0xff]   ;;  %v1243_v25 = vld [vmem:[#allocation2 + $0x58] sm:$0xff]  }
  0x3f   :  { %1173 = vmatpush3.bf16.msra.mxu1 %v1249_v10  ;;  %v1244_v26 = vld [vmem:[#allocation2 + $0x60] sm:$0xff]   ;;  %v1245_v27 = vld [vmem:[#allocation2 + $0x68] sm:$0xff]   ;;  %v1246_v28 = vld [vmem:[#allocation2 + $0x70] sm:$0xff]  }
  0x40   :  { %1127 = vmatpush3.bf16.msra.mxu0 %v1226_v2  ;;  %1174 = vmatprep.subr.bf16.mxu1 %v1250_v11  ;;  %v1247_v29 = vld [vmem:[#allocation2 + $0x78] sm:$0xff]   ;;  %v1254_v30 = vld [vmem:[#allocation7 + $0x30] sm:$0xff]   ;;  %v1441_v32 = vld [vmem:[%s1529_s2] ss:$0 sm:$0xff] }
  0x41   :  { %1128 = vmatprep.subr.bf16.mxu0 %v1227_v3  ;;  %v1255_v31 = vld [vmem:[#allocation7 + $0x38] sm:$0xff]  }
  0x43   :  { %1175 = vmatpush3.bf16.msra.mxu1 %v1250_v11 }
  0x44   :  { %1129 = vmatpush3.bf16.msra.mxu0 %v1227_v3  ;;  %1176 = vmatprep.subr.bf16.mxu1 %v1251_v14 }
  0x45   :  { %1130 = vmatprep.subr.bf16.mxu0 %v1228_v5 }
  0x47   :  { %1177 = vmatpush3.bf16.msra.mxu1 %v1251_v14 }
  0x48   :  { %1131 = vmatpush3.bf16.msra.mxu0 %v1228_v5  ;;  %1178 = vmatprep.subr.bf16.mxu1 %v1252_v15 }
  0x49   :  { %1132 = vmatprep.subr.bf16.mxu0 %v1229_v6 }
  0x4b   :  { %1179 = vmatpush3.bf16.msra.mxu1 %v1252_v15 }
  0x4c   :  { %1133 = vmatpush3.bf16.msra.mxu0 %v1229_v6  ;;  %1180 = vmatprep.subr.bf16.mxu1 %v1253_v18 }
  0x4d   :  { %1134 = vmatprep.subr.bf16.mxu0 %v1230_v7 }
  0x4f   :  { %1181 = vmatpush3.bf16.msra.mxu1 %v1253_v18 }
  0x50   :  { %1135 = vmatpush3.bf16.msra.mxu0 %v1230_v7  ;;  %1182 = vmatprep.subr.bf16.mxu1 %v1254_v30 }
  0x51   :  { %1136 = vmatprep.subr.bf16.mxu0 %v1231_v8 }
  0x53   :  { %1183 = vmatpush3.bf16.msra.mxu1 %v1254_v30 }
  0x54   :  { %1137 = vmatpush3.bf16.msra.mxu0 %v1231_v8  ;;  %1184 = vmatprep.subr.bf16.mxu1 %v1255_v31 }
  0x57   :  { %1139 = vmatmul.mubr.bf16.vlgmr.msra.gmra.mrb[0].mxu0 %v1233_v12  ;;  %1185 = vmatpush3.bf16.msra.mxu1 %v1255_v31 }
  0x58   :  { %1142 = vmatprep.mubr.bf16.mxu0 %v1234_v13 }
  0x5f   :  { %1143 = vmatmul.mubr.bf16.gmra.mrb[4].mxu0 %v1235_v16 }
  0x60   :  { %1146 = vmatprep.mubr.bf16.mxu0 %v1236_v17 }
  0x67   :  { %1147 = vmatmul.mubr.bf16.gmra.mrb[8].mxu0 %v1237_v19 }
  0x68   :  { %1150 = vmatprep.mubr.bf16.mxu0 %v1238_v20 }
  0x6f   :  { %1151 = vmatmul.mubr.bf16.gmra.mrb[12].mxu0 %v1239_v21 }
  0x70   :  { %1154 = vmatprep.mubr.bf16.mxu0 %v1240_v22 }
  0x77   :  { %1155 = vmatmul.mubr.bf16.gmra.mrb[16].mxu0 %v1241_v23 }
  0x78   :  { %1158 = vmatprep.mubr.bf16.mxu0 %v1242_v24 }
  0x7f   :  { %1159 = vmatmul.mubr.bf16.gmra.mrb[20].mxu0 %v1243_v25 }
  0x80   :  { %1162 = vmatprep.mubr.bf16.mxu0 %v1244_v26 }
  0x87   :  { %1163 = vmatmul.mubr.bf16.gmra.mrb[24].mxu0 %v1245_v27 }
  0x88   :  { %1166 = vmatprep.mubr.bf16.mxu0 %v1246_v28 }
  0x8f   :  { %1167 = vmatmul.mubr.bf16.gmra.mrb[28].mxu0 %v1247_v29 }
 0x12a   :  { %v1140_v33 = vpop.f32.mrb[0].mxu0 }
 0x12b   :  { %v305_v34 = vadd.f32 %v1140_v33, %v1441_v32  ;;  %v296_v35 = vpop.f32.mrb[1].mxu0 }
 0x12c   :  { %v297_v36 = vadd.f32 %v1441_v32, %v296_v35  ;;  %v1141_v37 = vpop.f32.mrb[2].mxu0 }
 0x12d   :  { %v308_v38 = vadd.f32 %v1141_v37, %v1441_v32  ;;  %v299_v39 = vpop.f32.mrb[3].mxu0  ;;  %v425_v41 = vmax.f32 %v305_v34, 0.0 }
 0x12e   :  { %v300_v40 = vadd.f32 %v1441_v32, %v299_v39  ;;  %v423_v43 = vmax.f32 %v297_v36, 0.0 }
 0x12f   :  { %v426_v42 = vmax.f32 %v308_v38, 0.0 }
 0x130   :  { %v424_v44 = vmax.f32 %v300_v40, 0.0 }
 0x131   :  { %v456_v45 = vpack.c.bf16 %v426_v42, %v425_v41 }
 0x132   :  { %v1144_v46 = vpop.f32.mrb[4].mxu0  ;;  %v455_v47 = vpack.c.bf16 %v424_v44, %v423_v43 }
 0x133   :  { %v321_v48 = vadd.f32 %v1144_v46, %v1441_v32  ;;  %v312_v49 = vpop.f32.mrb[5].mxu0 }
 0x134   :  { %v313_v50 = vadd.f32 %v1441_v32, %v312_v49  ;;  %v1145_v51 = vpop.f32.mrb[6].mxu0  ;;  %1186 = vmatprep.mubr.bf16.mxu1 %v455_v47 }
 0x135   :  { %v324_v52 = vadd.f32 %v1145_v51, %v1441_v32  ;;  %v315_v53 = vpop.f32.mrb[7].mxu0  ;;  %1187 = vmatmul.mubr.bf16.vlgmr.msra.gmra.mrb[0].mxu1 %v456_v45  ;;  %v429_v55 = vmax.f32 %v321_v48, 0.0 }
 0x136   :  { %v316_v54 = vadd.f32 %v1441_v32, %v315_v53  ;;  %v427_v57 = vmax.f32 %v313_v50, 0.0 }
 0x137   :  { %v430_v56 = vmax.f32 %v324_v52, 0.0 }
 0x138   :  { %v428_v58 = vmax.f32 %v316_v54, 0.0 }
 0x139   :  { %v458_v59 = vpack.c.bf16 %v430_v56, %v429_v55 }
 0x13a   :  { %v457_v60 = vpack.c.bf16 %v428_v58, %v427_v57  ;;  %v1148_v61 = vpop.f32.mrb[8].mxu0 }
 0x13b   :  { %v337_v62 = vadd.f32 %v1148_v61, %v1441_v32  ;;  %v328_v63 = vpop.f32.mrb[9].mxu0 }
 0x13c   :  { %v329_v0 = vadd.f32 %v1441_v32, %v328_v63  ;;  %v1149_v1 = vpop.f32.mrb[10].mxu0  ;;  %1190 = vmatprep.mubr.bf16.mxu1 %v457_v60 }
 0x13d   :  { %v340_v2 = vadd.f32 %v1149_v1, %v1441_v32  ;;  %v331_v3 = vpop.f32.mrb[11].mxu0  ;;  %1191 = vmatmul.mubr.bf16.gmra.mrb[4].mxu1 %v458_v59  ;;  %v433_v5 = vmax.f32 %v337_v62, 0.0 }
 0x13e   :  { %v332_v4 = vadd.f32 %v1441_v32, %v331_v3  ;;  %v431_v7 = vmax.f32 %v329_v0, 0.0 }
 0x13f   :  { %v434_v6 = vmax.f32 %v340_v2, 0.0 }
 0x140   :  { %v432_v8 = vmax.f32 %v332_v4, 0.0 }
 0x141   :  { %v460_v9 = vpack.c.bf16 %v434_v6, %v433_v5 }
 0x142   :  { %v459_v10 = vpack.c.bf16 %v432_v8, %v431_v7  ;;  %v1152_v11 = vpop.f32.mrb[12].mxu0 }
 0x143   :  { %v353_v12 = vadd.f32 %v1152_v11, %v1441_v32  ;;  %v344_v13 = vpop.f32.mrb[13].mxu0 }
 0x144   :  { %v345_v14 = vadd.f32 %v1441_v32, %v344_v13  ;;  %v1153_v15 = vpop.f32.mrb[14].mxu0  ;;  %1194 = vmatprep.mubr.bf16.mxu1 %v459_v10 }
 0x145   :  { %v356_v16 = vadd.f32 %v1153_v15, %v1441_v32  ;;  %v347_v17 = vpop.f32.mrb[15].mxu0  ;;  %1195 = vmatmul.mubr.bf16.gmra.mrb[8].mxu1 %v460_v9  ;;  %v437_v19 = vmax.f32 %v353_v12, 0.0 }
 0x146   :  { %v348_v18 = vadd.f32 %v1441_v32, %v347_v17  ;;  %v435_v21 = vmax.f32 %v345_v14, 0.0 }
 0x147   :  { %v438_v20 = vmax.f32 %v356_v16, 0.0 }
 0x148   :  { %v436_v22 = vmax.f32 %v348_v18, 0.0 }
 0x149   :  { %v462_v23 = vpack.c.bf16 %v438_v20, %v437_v19  ;;  %v1478_v19 = vld [vmem:[%s1531_s4] ss:$0 sm:$0xff]  ;;  %s1355_s4 = smov [#allocation8]  }
 0x14a   :  { %v461_v24 = vpack.c.bf16 %v436_v22, %v435_v21  ;;  %v1156_v25 = vpop.f32.mrb[16].mxu0  ;;  %s868_s8 = sshll.u32 %s1355_s4, 4  ;;  %s869_s8 = int_to_ptr.vmem [resolvable:$true] %s868_s8 }
 0x14b   :  { %v369_v26 = vadd.f32 %v1156_v25, %v1441_v32  ;;  %v360_v27 = vpop.f32.mrb[17].mxu0  ;;  %s1322_s9 = scalar_lea.vmem %s869_s8, 2048  ;;  %p1327_p11 = scmp.lt.s32.totalorder %s869_s8, %s869_s8 }
 0x14c   :  { %v361_v28 = vadd.f32 %v1441_v32, %v360_v27  ;;  %v1157_v29 = vpop.f32.mrb[18].mxu0  ;;  %1198 = vmatprep.mubr.bf16.mxu1 %v461_v24  ;;  %p1323_p10 = scmp.ne.s32.totalorder %s869_s8, %s1322_s9  ;;  %p1328_p12 = scmp.lt.s32.totalorder %s1322_s9, %s1322_s9 }
 0x14d   :  { %v372_v30 = vadd.f32 %v1157_v29, %v1441_v32  ;;  %v363_v31 = vpop.f32.mrb[19].mxu0  ;;  %1199 = vmatmul.mubr.bf16.gmra.mrb[12].mxu1 %v462_v23  ;;  %v441_v34 = vmax.f32 %v369_v26, 0.0 }
 0x14e   :  { %v364_v33 = vadd.f32 %v1441_v32, %v363_v31  ;;  %v439_v36 = vmax.f32 %v361_v28, 0.0  ;;  %p1329_p13 = por %p1328_p12, %p1327_p11 }
 0x14f   :  { %v442_v35 = vmax.f32 %v372_v30, 0.0 }
 0x150   :  { %v440_v37 = vmax.f32 %v364_v33, 0.0  ;;  %p1330_p0 = pnand %p1329_p13, %p1323_p10 }
 0x151   :  { %v464_v38 = vpack.c.bf16 %v442_v35, %v441_v34 }
 0x152   :  { %v463_v39 = vpack.c.bf16 %v440_v37, %v439_v36  ;;  %v1160_v40 = vpop.f32.mrb[20].mxu0 }
 0x153   :  { %v385_v41 = vadd.f32 %v1160_v40, %v1441_v32  ;;  %v376_v42 = vpop.f32.mrb[21].mxu0 }
 0x154   :  { %v377_v43 = vadd.f32 %v1441_v32, %v376_v42  ;;  %v1161_v44 = vpop.f32.mrb[22].mxu0  ;;  %1202 = vmatprep.mubr.bf16.mxu1 %v463_v39 }
 0x155   :  { %v388_v45 = vadd.f32 %v1161_v44, %v1441_v32  ;;  %v379_v46 = vpop.f32.mrb[23].mxu0  ;;  %1203 = vmatmul.mubr.bf16.gmra.mrb[16].mxu1 %v464_v38  ;;  %v445_v48 = vmax.f32 %v385_v41, 0.0 }
 0x156   :  { %v380_v47 = vadd.f32 %v1441_v32, %v379_v46  ;;  %v443_v50 = vmax.f32 %v377_v43, 0.0 }
 0x157   :  { %v446_v49 = vmax.f32 %v388_v45, 0.0 }
 0x158   :  { %v444_v51 = vmax.f32 %v380_v47, 0.0 }
 0x159   :  { %v466_v52 = vpack.c.bf16 %v446_v49, %v445_v48 }
 0x15a   :  { %v465_v53 = vpack.c.bf16 %v444_v51, %v443_v50  ;;  %v1164_v54 = vpop.f32.mrb[24].mxu0 }
 0x15b   :  { %v401_v55 = vadd.f32 %v1164_v54, %v1441_v32  ;;  %v392_v56 = vpop.f32.mrb[25].mxu0 }
 0x15c   :  { %v393_v57 = vadd.f32 %v1441_v32, %v392_v56  ;;  %v1165_v58 = vpop.f32.mrb[26].mxu0  ;;  %1206 = vmatprep.mubr.bf16.mxu1 %v465_v53 }
 0x15d   :  { %v404_v59 = vadd.f32 %v1165_v58, %v1441_v32  ;;  %v395_v60 = vpop.f32.mrb[27].mxu0  ;;  %1207 = vmatmul.mubr.bf16.gmra.mrb[20].mxu1 %v466_v52  ;;  %v449_v62 = vmax.f32 %v401_v55, 0.0 }
 0x15e   :  { %v396_v61 = vadd.f32 %v1441_v32, %v395_v60  ;;  %v447_v0 = vmax.f32 %v393_v57, 0.0 }
 0x15f   :  { %v450_v63 = vmax.f32 %v404_v59, 0.0 }
 0x160   :  { %v448_v1 = vmax.f32 %v396_v61, 0.0 }
 0x161   :  { %v468_v2 = vpack.c.bf16 %v450_v63, %v449_v62 }
 0x162   :  { %v467_v3 = vpack.c.bf16 %v448_v1, %v447_v0  ;;  %v1168_v4 = vpop.f32.mrb[28].mxu0 }
 0x163   :  { %v417_v5 = vadd.f32 %v1168_v4, %v1441_v32  ;;  %v408_v6 = vpop.f32.mrb[29].mxu0 }
 0x164   :  { %v409_v7 = vadd.f32 %v1441_v32, %v408_v6  ;;  %v1169_v8 = vpop.f32.mrb[30].mxu0  ;;  %1210 = vmatprep.mubr.bf16.mxu1 %v467_v3 }
 0x165   :  { %v420_v9 = vadd.f32 %v1169_v8, %v1441_v32  ;;  %v411_v10 = vpop.f32.mrb[31].mxu0  ;;  %1211 = vmatmul.mubr.bf16.gmra.mrb[24].mxu1 %v468_v2  ;;  %v453_v12 = vmax.f32 %v417_v5, 0.0 }
 0x166   :  { %v412_v11 = vadd.f32 %v1441_v32, %v411_v10  ;;  %v451_v14 = vmax.f32 %v409_v7, 0.0 }
 0x167   :  { %v454_v13 = vmax.f32 %v420_v9, 0.0 }
 0x168   :  { %v452_v15 = vmax.f32 %v412_v11, 0.0 }
 0x169   :  { %v470_v16 = vpack.c.bf16 %v454_v13, %v453_v12 }
 0x16a   :  { %v469_v17 = vpack.c.bf16 %v452_v15, %v451_v14 }
 0x16c   :  { %1214 = vmatprep.mubr.bf16.mxu1 %v469_v17 }
 0x16d   :  { %1215 = vmatmul.mubr.bf16.gmra.mrb[28].mxu1 %v470_v16 }
 0x208   :  { %v1188_v18 = vpop.f32.mrb[0].mxu1 }
 0x209   :  { %v576_v20 = vpop.f32.mrb[1].mxu1  ;;  %v585_v22 = vadd.f32 %v1188_v18, %v1478_v19 }
 0x20a   :  { %v1189_v21 = vpop.f32.mrb[2].mxu1  ;;  %v577_v24 = vadd.f32 %v1478_v19, %v576_v20 }
 0x20b   :  { %v588_v32 = vadd.f32 %v1189_v21, %v1478_v19  ;;  %v579_v23 = vpop.f32.mrb[3].mxu1 }
 0x20c   :  { %v580_v25 = vadd.f32 %v1478_v19, %v579_v23 }
 0x20d   :  { %v987_v26 = vpack.c.bf16 %v588_v32, %v585_v22 }
 0x20e   :  { %v982_v27 = vpack.c.bf16 %v580_v25, %v577_v24 }
 0x20f   :  { %1059 = vst [vmem:[#allocation8 + $0x8] sm:$0xff] %v987_v26  }
 0x210   :  { %983 = vst [vmem:[#allocation8] sm:$0xff] %v982_v27   ;;  %v1192_v28 = vpop.f32.mrb[4].mxu1 }
 0x211   :  { %v592_v29 = vpop.f32.mrb[5].mxu1  ;;  %v601_v31 = vadd.f32 %v1192_v28, %v1478_v19 }
 0x212   :  { %v1193_v30 = vpop.f32.mrb[6].mxu1  ;;  %v593_v35 = vadd.f32 %v1478_v19, %v592_v29 }
 0x213   :  { %v604_v33 = vadd.f32 %v1193_v30, %v1478_v19  ;;  %v595_v34 = vpop.f32.mrb[7].mxu1 }
 0x214   :  { %v596_v36 = vadd.f32 %v1478_v19, %v595_v34 }
 0x215   :  { %v997_v37 = vpack.c.bf16 %v604_v33, %v601_v31 }
 0x216   :  { %v992_v38 = vpack.c.bf16 %v596_v36, %v593_v35 }
 0x217   :  { %1061 = vst [vmem:[#allocation8 + $0x18] sm:$0xff] %v997_v37  }
 0x218   :  { %1060 = vst [vmem:[#allocation8 + $0x10] sm:$0xff] %v992_v38   ;;  %v1196_v39 = vpop.f32.mrb[8].mxu1 }
 0x219   :  { %v608_v40 = vpop.f32.mrb[9].mxu1  ;;  %v617_v42 = vadd.f32 %v1196_v39, %v1478_v19 }
 0x21a   :  { %v1197_v41 = vpop.f32.mrb[10].mxu1  ;;  %v609_v45 = vadd.f32 %v1478_v19, %v608_v40 }
 0x21b   :  { %v620_v43 = vadd.f32 %v1197_v41, %v1478_v19  ;;  %v611_v44 = vpop.f32.mrb[11].mxu1 }
 0x21c   :  { %v612_v46 = vadd.f32 %v1478_v19, %v611_v44 }
 0x21d   :  { %v1007_v47 = vpack.c.bf16 %v620_v43, %v617_v42 }
 0x21e   :  { %v1002_v48 = vpack.c.bf16 %v612_v46, %v609_v45 }
 0x21f   :  { %1063 = vst [vmem:[#allocation8 + $0x28] sm:$0xff] %v1007_v47  }
 0x220   :  { %1062 = vst [vmem:[#allocation8 + $0x20] sm:$0xff] %v1002_v48   ;;  %v1200_v49 = vpop.f32.mrb[12].mxu1 }
 0x221   :  { %v624_v50 = vpop.f32.mrb[13].mxu1  ;;  %v633_v52 = vadd.f32 %v1200_v49, %v1478_v19 }
 0x222   :  { %v1201_v51 = vpop.f32.mrb[14].mxu1  ;;  %v625_v55 = vadd.f32 %v1478_v19, %v624_v50 }
 0x223   :  { %v636_v53 = vadd.f32 %v1201_v51, %v1478_v19  ;;  %v627_v54 = vpop.f32.mrb[15].mxu1 }
 0x224   :  { %v628_v56 = vadd.f32 %v1478_v19, %v627_v54 }
 0x225   :  { %v1017_v57 = vpack.c.bf16 %v636_v53, %v633_v52 }
 0x226   :  { %v1012_v58 = vpack.c.bf16 %v628_v56, %v625_v55 }
 0x227   :  { %1065 = vst [vmem:[#allocation8 + $0x38] sm:$0xff] %v1017_v57  }
 0x228   :  { %1064 = vst [vmem:[#allocation8 + $0x30] sm:$0xff] %v1012_v58   ;;  %v1204_v59 = vpop.f32.mrb[16].mxu1 }
 0x229   :  { %v640_v60 = vpop.f32.mrb[17].mxu1  ;;  %v649_v62 = vadd.f32 %v1204_v59, %v1478_v19 }
 0x22a   :  { %v1205_v61 = vpop.f32.mrb[18].mxu1  ;;  %v641_v1 = vadd.f32 %v1478_v19, %v640_v60 }
 0x22b   :  { %v652_v63 = vadd.f32 %v1205_v61, %v1478_v19  ;;  %v643_v0 = vpop.f32.mrb[19].mxu1 }
 0x22c   :  { %v644_v2 = vadd.f32 %v1478_v19, %v643_v0 }
 0x22d   :  { %v1027_v3 = vpack.c.bf16 %v652_v63, %v649_v62 }
 0x22e   :  { %v1022_v4 = vpack.c.bf16 %v644_v2, %v641_v1 }
 0x22f   :  { %1067 = vst [vmem:[#allocation8 + $0x48] sm:$0xff] %v1027_v3  }
 0x230   :  { %1066 = vst [vmem:[#allocation8 + $0x40] sm:$0xff] %v1022_v4   ;;  %v1208_v5 = vpop.f32.mrb[20].mxu1 }
 0x231   :  { %v656_v6 = vpop.f32.mrb[21].mxu1  ;;  %v665_v8 = vadd.f32 %v1208_v5, %v1478_v19 }
 0x232   :  { %v1209_v7 = vpop.f32.mrb[22].mxu1  ;;  %v657_v11 = vadd.f32 %v1478_v19, %v656_v6 }
 0x233   :  { %v668_v9 = vadd.f32 %v1209_v7, %v1478_v19  ;;  %v659_v10 = vpop.f32.mrb[23].mxu1 }
 0x234   :  { %v660_v12 = vadd.f32 %v1478_v19, %v659_v10 }
 0x235   :  { %v1037_v13 = vpack.c.bf16 %v668_v9, %v665_v8 }
 0x236   :  { %v1032_v14 = vpack.c.bf16 %v660_v12, %v657_v11 }
 0x237   :  { %1069 = vst [vmem:[#allocation8 + $0x58] sm:$0xff] %v1037_v13  }
 0x238   :  { %1068 = vst [vmem:[#allocation8 + $0x50] sm:$0xff] %v1032_v14   ;;  %v1212_v15 = vpop.f32.mrb[24].mxu1 }
 0x239   :  { %v672_v16 = vpop.f32.mrb[25].mxu1  ;;  %v681_v18 = vadd.f32 %v1212_v15, %v1478_v19 }
 0x23a   :  { %v1213_v17 = vpop.f32.mrb[26].mxu1  ;;  %v673_v22 = vadd.f32 %v1478_v19, %v672_v16 }
 0x23b   :  { %v684_v20 = vadd.f32 %v1213_v17, %v1478_v19  ;;  %v675_v21 = vpop.f32.mrb[27].mxu1 }
 0x23c   :  { %v676_v32 = vadd.f32 %v1478_v19, %v675_v21 }
 0x23d   :  { %v1047_v23 = vpack.c.bf16 %v684_v20, %v681_v18 }
 0x23e   :  { %v1042_v24 = vpack.c.bf16 %v676_v32, %v673_v22 }
 0x23f   :  { %1071 = vst [vmem:[#allocation8 + $0x68] sm:$0xff] %v1047_v23  }
 0x240   :  { %1070 = vst [vmem:[#allocation8 + $0x60] sm:$0xff] %v1042_v24   ;;  %v1216_v25 = vpop.f32.mrb[28].mxu1 }
 0x241   :  { %v688_v26 = vpop.f32.mrb[29].mxu1  ;;  %v697_v28 = vadd.f32 %v1216_v25, %v1478_v19 }
 0x242   :  { %v1217_v27 = vpop.f32.mrb[30].mxu1  ;;  %v689_v31 = vadd.f32 %v1478_v19, %v688_v26 }
 0x243   :  { %v700_v29 = vadd.f32 %v1217_v27, %v1478_v19  ;;  %v691_v30 = vpop.f32.mrb[31].mxu1 }
 0x244   :  { %v692_v33 = vadd.f32 %v1478_v19, %v691_v30 }
 0x245   :  { %v1057_v34 = vpack.c.bf16 %v700_v29, %v697_v28 }
 0x246   :  { %v1052_v35 = vpack.c.bf16 %v692_v33, %v689_v31 }
 0x247   :  { %1073 = vst [vmem:[#allocation8 + $0x78] sm:$0xff] %v1057_v34  }
 0x248   :  { %1072 = vst [vmem:[#allocation8 + $0x70] sm:$0xff] %v1052_v35  }
 0x249   :  { %1333 = shalt.err (!%p1330_p0)
}
 0x24a   :  { %s1334_s12 = scalar_lea.hbm %s1532_s5, 2048 }
 0x24b   :  { %p1335_p1 = scmp.ne.s32.totalorder %s1532_s5, %s1334_s12  ;;  %p1338_p2 = scmp.lt.u32.totalorder %s1334_s12, %s1532_s5 }
 0x24d   :  { %p1340_p3 = pnand %p1338_p2, %p1335_p1 }
 0x24f   :  { %1343 = shalt.err (!%p1340_p3)
}
 0x250   :  { %874 = dma.vmem_to_hbm [thread:$0]  %s869_s8, 2048, %s1532_s5, [#allocation4], %s1352_s30, %s1352_s30, %s1353_s6  }
 0x251   :  { %1348 = dma.done.wait [#allocation4], 2048  }
 0x252   :  { %1349 = vsyncadd [#allocation4], 4294965248 }
 0x253   :  { %878 = vsyncpa [#allocation3], 1 }
 0x254   :  { %879 = vsyncpa [#allocation6], 1 }
 0x255   :  { %880 = vsyncpa [#allocation4], 1 }

</bundles_post_ra>
